<compile_context>
chip_gen: v5e
topology: v5e:2x2
jax: 0.10.0
libtpu: 0.0.40
codegen_flags: <defaults>
</compile_context>

<pallas_src>
import functools
import math

import jax
import jax.numpy as jnp
from jax.experimental import pallas as pl
from jax.experimental.pallas import tpu as pltpu

EPS = 1e-6


# ---------------------------------------------------------------------------
# Kernel
# ---------------------------------------------------------------------------
def layernorm_kernel(x_ref, g_ref, b_ref, o_ref, *, eps, approx_recip):
    x = x_ref[...].astype(jnp.float32)                       # (TM, D)
    d = x.shape[-1]
    mean = jnp.mean(x, axis=-1, keepdims=True)               # (TM, 1)
    diff = x - mean
    # Unbiased variance (ddof = 1), matching torch.Tensor.std's default.
    var = jnp.sum(diff * diff, axis=-1, keepdims=True) * (1.0 / (d - 1))
    std = jnp.sqrt(var)
    # EUP reciprocal on a (TM, 1) column instead of a full-width divide.
    inv = pl.reciprocal(std + eps, approx=approx_recip)
    o_ref[...] = (g_ref[...] * (diff * inv) + b_ref[...]).astype(o_ref.dtype)


# ---------------------------------------------------------------------------
# Wrapper
# ---------------------------------------------------------------------------
def layer_norm(x, gamma, beta, *, eps=EPS, block_rows=512, approx_recip=True):
    """gamma * (x - mean) / (std + eps) + beta over the last axis (ddof=1 std)."""
    orig_shape = x.shape
    D = orig_shape[-1]
    M = int(math.prod(orig_shape[:-1])) if len(orig_shape) > 1 else 1
    x2 = x.reshape(M, D)

    # Row tile: a multiple of 8 sublanes, or the full extent if M is small.
    assert block_rows % 8 == 0
    tm = M if M <= block_rows else block_rows
    m_pad = pl.cdiv(M, tm) * tm
    if m_pad != M:
        x2 = jnp.pad(x2, ((0, m_pad - M), (0, 0)))           # padded rows are dropped below

    kernel = functools.partial(layernorm_kernel, eps=eps, approx_recip=approx_recip)
    out = pl.pallas_call(
        kernel,
        out_shape=jax.ShapeDtypeStruct((m_pad, D), x.dtype),
        grid=(m_pad // tm,),
        in_specs=[
            pl.BlockSpec((tm, D), lambda i: (i, 0)),          # row tile of x
            pl.BlockSpec((1, D), lambda i: (0, 0)),           # gamma (resident)
            pl.BlockSpec((1, D), lambda i: (0, 0)),           # beta  (resident)
        ],
        out_specs=pl.BlockSpec((tm, D), lambda i: (i, 0)),
        compiler_params=pltpu.CompilerParams(
            dimension_semantics=("parallel",)),               # megacore-shardable on v7x
    )(x2,
      gamma.reshape(1, D).astype(jnp.float32),
      beta.reshape(1, D).astype(jnp.float32))

    if m_pad != M:
        out = out[:M]
    return out.reshape(orig_shape)


# Pure-JAX reference (exact divide) for the correctness check.
def layer_norm_ref(x, gamma, beta, eps=EPS):
    d = x.shape[-1]
    mean = jnp.mean(x, axis=-1, keepdims=True)
    diff = x - mean
    var = jnp.sum(diff * diff, axis=-1, keepdims=True) / (d - 1)
    std = jnp.sqrt(var)
    return gamma * diff / (std + eps) + beta


# ---------------------------------------------------------------------------
# Demo / self-test
# ---------------------------------------------------------------------------
if __name__ == "__main__":
    key = jax.random.PRNGKey(0)
    k1, k2, k3, k4 = jax.random.split(key, 4)

    D = 32
    # Token-stream style input: (batch, seq, embed_dim).
    x_small = jax.random.normal(k1, (2, 8, D), jnp.float32)
    # Larger, non-aligned row count (M = 300) to exercise row tiling + padding.
    x_big = jax.random.normal(k2, (3, 100, D), jnp.float32)

    gamma = 1.0 + 0.1 * jax.random.normal(k3, (D,), jnp.float32)
    beta = 0.1 * jax.random.normal(k4, (D,), jnp.float32)

    fwd_small = jax.jit(functools.partial(layer_norm, block_rows=512))
    fwd_big = jax.jit(functools.partial(layer_norm, block_rows=128))

    y_small = fwd_small(x_small, gamma, beta)
    y_big = fwd_big(x_big, gamma, beta)
    jax.block_until_ready((y_small, y_big))

    ref_small = layer_norm_ref(x_small, gamma, beta)
    ref_big = layer_norm_ref(x_big, gamma, beta)

    assert y_small.shape == x_small.shape and y_big.shape == x_big.shape
    assert bool(jnp.all(jnp.isfinite(y_small))) and bool(jnp.all(jnp.isfinite(y_big)))
    # Approx reciprocal carries ~2^-12 relative error; allow a loose tolerance.
    assert bool(jnp.allclose(y_small, ref_small, rtol=5e-3, atol=5e-3))
    assert bool(jnp.allclose(y_big, ref_big, rtol=5e-3, atol=5e-3))
    print("KERNEL_OK")
</pallas_src>

<mosaic_0001>
module attributes {stable_mosaic.version = 11 : i64} {
  func.func @layernorm_kernel(%arg0: i32, %arg1: memref<16x32xf32, #tpu.memory_space<vmem>>, %arg2: memref<1x32xf32, #tpu.memory_space<vmem>>, %arg3: memref<1x32xf32, #tpu.memory_space<vmem>>, %arg4: memref<16x32xf32, #tpu.memory_space<vmem>>) attributes {dimension_semantics = [#tpu.dimension_semantics<parallel>], iteration_bounds = array<i64: 1>, scalar_prefetch = 0 : i64, scratch_operands = 0 : i64, tpu.core_type = #tpu.core_type<tc>, window_params = [{transform_indices = @transform_0, window_bounds = array<i64: 16, 32>}, {pipeline_mode = #tpu.pipeline_mode<synchronous>, transform_indices = @transform_1, window_bounds = array<i64: 1, 32>}, {pipeline_mode = #tpu.pipeline_mode<synchronous>, transform_indices = @transform_2, window_bounds = array<i64: 1, 32>}, {transform_indices = @transform_3, window_bounds = array<i64: 16, 32>}]} {
    %c0 = arith.constant 0 : index
    %c0_0 = arith.constant 0 : index
    %0 = vector.load %arg1[%c0, %c0_0] : memref<16x32xf32, #tpu.memory_space<vmem>>, vector<16x32xf32>
    %cst = arith.constant dense<0.000000e+00> : vector<16xf32>
    %1 = vector.multi_reduction <add>, %0, %cst [1] : vector<16x32xf32> to vector<16xf32>
    %2 = vector.shape_cast %1 : vector<16xf32> to vector<16x1xf32>
    %cst_1 = arith.constant 3.200000e+01 : f32
    %3 = vector.broadcast %cst_1 : f32 to vector<16x1xf32>
    %4 = arith.divf %2, %3 : vector<16x1xf32>
    %5 = vector.broadcast %4 : vector<16x1xf32> to vector<16x32xf32>
    %6 = arith.subf %0, %5 : vector<16x32xf32>
    %7 = arith.mulf %6, %6 : vector<16x32xf32>
    %cst_2 = arith.constant dense<0.000000e+00> : vector<16xf32>
    %8 = vector.multi_reduction <add>, %7, %cst_2 [1] : vector<16x32xf32> to vector<16xf32>
    %9 = vector.shape_cast %8 : vector<16xf32> to vector<16x1xf32>
    %cst_3 = arith.constant 0.0322580636 : f32
    %10 = vector.broadcast %cst_3 : f32 to vector<16x1xf32>
    %11 = arith.mulf %9, %10 : vector<16x1xf32>
    %12 = math.sqrt %11 : vector<16x1xf32>
    %cst_4 = arith.constant 9.99999997E-7 : f32
    %13 = vector.broadcast %cst_4 : f32 to vector<16x1xf32>
    %14 = arith.addf %12, %13 : vector<16x1xf32>
    %15 = tpu.reciprocal %14 {approx = true} : vector<16x1xf32> -> vector<16x1xf32>
    %c0_5 = arith.constant 0 : index
    %c0_6 = arith.constant 0 : index
    %16 = vector.load %arg2[%c0_5, %c0_6] : memref<1x32xf32, #tpu.memory_space<vmem>>, vector<1x32xf32>
    %17 = vector.broadcast %15 : vector<16x1xf32> to vector<16x32xf32>
    %18 = arith.mulf %6, %17 : vector<16x32xf32>
    %19 = vector.broadcast %16 : vector<1x32xf32> to vector<16x32xf32>
    %20 = arith.mulf %19, %18 : vector<16x32xf32>
    %c0_7 = arith.constant 0 : index
    %c0_8 = arith.constant 0 : index
    %21 = vector.load %arg3[%c0_7, %c0_8] : memref<1x32xf32, #tpu.memory_space<vmem>>, vector<1x32xf32>
    %22 = vector.broadcast %21 : vector<1x32xf32> to vector<16x32xf32>
    %23 = arith.addf %20, %22 : vector<16x32xf32>
    %c0_9 = arith.constant 0 : index
    %c0_10 = arith.constant 0 : index
    %24 = vector.load %arg4[%c0_9, %c0_10] : memref<16x32xf32, #tpu.memory_space<vmem>>, vector<16x32xf32>
    tpu.vector_store %arg4[%c0_9, %c0_10], %23 {strides = array<i32>} : memref<16x32xf32, #tpu.memory_space<vmem>>, vector<16x32xf32>,
    return
  }
  func.func @transform_0(%arg0: i32) -> (i32, i32) {
    %c0_i32 = arith.constant 0 : i32
    %c0_i32_0 = arith.constant 0 : i32
    return %arg0, %c0_i32 : i32, i32
  }
  func.func @transform_1(%arg0: i32) -> (i32, i32) {
    %c0_i32 = arith.constant 0 : i32
    %c0_i32_0 = arith.constant 0 : i32
    %c0_i32_1 = arith.constant 0 : i32
    return %c0_i32, %c0_i32_0 : i32, i32
  }
  func.func @transform_2(%arg0: i32) -> (i32, i32) {
    %c0_i32 = arith.constant 0 : i32
    %c0_i32_0 = arith.constant 0 : i32
    %c0_i32_1 = arith.constant 0 : i32
    return %c0_i32, %c0_i32_0 : i32, i32
  }
  func.func @transform_3(%arg0: i32) -> (i32, i32) {
    %c0_i32 = arith.constant 0 : i32
    %c0_i32_0 = arith.constant 0 : i32
    return %arg0, %c0_i32 : i32, i32
  }
}

</mosaic_0001>

<bundles_post_ra>
// kernel: layer_norm.1
= control target key start
LH: loop header
LB: loop body
LE: loop exit
PB: predicated region body
PF: predicated region fallthrough
CT: control target
= control target key end

     0   :  { %8 = vsyncpa [#allocation3], 0  ;;  %s242_s0 = inlined_call_operand.hbm [shape: f32[16,32], index: 0, kind: input, shape index: {}]   ;;  %s243_s1 = inlined_call_operand.vmem [shape: f32[1,32], index: 1, kind: input, shape index: {}]   ;;  %s244_s2 = inlined_call_operand.vmem [shape: f32[1,32], index: 2, kind: input, shape index: {}]   ;;  %s245_s3 = inlined_call_operand.hbm [shape: f32[16,32], index: 3, kind: output, shape index: {}]  }
   0x1   :  { %9 = vsyncpa [#allocation4], 0  ;;  %s14_s14 = sshll.u32 %s242_s0, 4  ;;  %s193_s15 = smov [#allocation2]   ;;  %s15_s14 = int_to_ptr.hbm [resolvable:$true] %s14_s14 }
   0x2   :  { %s16_s16 = sshll.u32 %s193_s15, 4  ;;  %s194_s17 = smov 128   ;;  %s17_s16 = int_to_ptr.vmem [resolvable:$true] %s16_s16 }
   0x3   :  { %s195_s18 = smov 8  }
   0x4   :  { %22 = dma.hbm_to_vmem [thread:$0]  %s15_s14, 256, %s17_s16, [#allocation3], %s194_s17, %s194_s17, %s195_s18  }
   0x5   :  { %189 = dma.done.wait [#allocation3], 256  }
   0x6   :  { %190 = vsyncadd [#allocation3], 4294967040  ;;  %vm33_vm0 = vcmask 261120   ;;  %v31_v0 = vld [vmem:[#allocation2] sm:$0xff]  ;;  %v32_v2 = vld [vmem:[#allocation2 + $0x8] sm:$0xff]  ;;  %v196_v4 = vmov 32.0  }
   0x7   :  { %v34_v1 = vsel %vm33_vm0, %v31_v0, 0.0  ;;  %v37_v3 = vsel %vm33_vm0, %v32_v2, 0.0  ;;  %131 = vrcp.f32 %v196_v4  ;;  %v129_v46 = vld [vmem:[%s243_s1] ss:$0 sm:$0xff]  ;;  %s197_s22 = smov [#allocation5]   ;;  %s111_s1 = sshll.u32 %s245_s3, 4  ;;  %s112_s1 = int_to_ptr.hbm [resolvable:$true] %s111_s1 }
   0x8   :  { %35 = vadd.xlane.f32.xlu0 %v34_v1  ;;  %v130_v50 = vld [vmem:[%s244_s2] ss:$0 sm:$0xff]  ;;  %s109_s23 = sshll.u32 %s197_s22, 4  ;;  %s110_s23 = int_to_ptr.vmem [resolvable:$true] %s109_s23 }
   0xd   :  { %v132_v5 = vpop.eup %131 }
   0xe   :  { %v41_v6 = vmul.f32 32.0, %v132_v5  ;;  %vm45_vm1 = vweird.f32 %v132_v5 }
  0x10   :  { %38 = vadd.xlane.f32.xlu0 %v37_v3  ;;  %v42_v7 = vsub.f32 1.0, %v41_v6 }
  0x12   :  { %v43_v8 = vmul.f32 %v132_v5, %v42_v7 }
  0x14   :  { %v44_v9 = vadd.f32 %v132_v5, %v43_v8 }
  0x16   :  { %v46_v10 = vsel %vm45_vm1, %v132_v5, %v44_v9 }
  0x7b   :  { %v36_v11 = vpop.xlane.xlu0 %35 }
  0x7c   :  { %v47_v12 = vmul.f32 %v46_v10, %v36_v11 }
  0x7e   :  { %v49_v13 = vsub.f32 %v31_v0, %v47_v12 }
  0x80   :  { %v51_v14 = vmul.f32 %v49_v13, %v49_v13 }
  0x82   :  { %v53_v15 = vsel %vm33_vm0, %v51_v14, 0.0 }
  0x83   :  { %54 = vadd.xlane.f32.xlu1 %v53_v15  ;;  %v39_v16 = vpop.xlane.xlu0 %38 }
  0x84   :  { %v48_v17 = vmul.f32 %v46_v10, %v39_v16 }
  0x86   :  { %v50_v18 = vsub.f32 %v32_v2, %v48_v17 }
  0x88   :  { %v52_v19 = vmul.f32 %v50_v18, %v50_v18 }
  0x8a   :  { %v56_v20 = vsel %vm33_vm0, %v52_v19, 0.0 }
  0x8b   :  { %57 = vadd.xlane.f32.xlu1 %v56_v20 }
  0xf6   :  { %v55_v21 = vpop.xlane.xlu1 %54 }
  0xf7   :  { %v59_v22 = vmul.f32 0.032258064, %v55_v21 }
  0xf9   :  { %133 = vrsqrt.f32 %v59_v22  ;;  %vm68_vm2 = vcmp.eq.f32.partialorder %v59_v22, inf  ;;  %v71_v35 = vand.u32 2147483648, %v59_v22  ;;  %vm70_vm3 = vcmp.eq.f32.partialorder %v59_v22, 0.0 }
  0xfe   :  { %v58_v23 = vpop.xlane.xlu1 %57 }
  0xff   :  { %v134_v24 = vpop.eup %133  ;;  %v60_v25 = vmul.f32 0.032258064, %v58_v23 }
 0x100   :  { %v62_v26 = vmul.f32 %v134_v24, %v59_v22 }
 0x101   :  { %135 = vrsqrt.f32 %v60_v25  ;;  %vm80_vm4 = vcmp.eq.f32.partialorder %v60_v25, inf  ;;  %v83_v43 = vand.u32 2147483648, %v60_v25  ;;  %vm82_vm5 = vcmp.eq.f32.partialorder %v60_v25, 0.0 }
 0x102   :  { %v63_v27 = vmul.f32 %v134_v24, %v62_v26 }
 0x104   :  { %v64_v28 = vmul.f32 0.5, %v63_v27 }
 0x106   :  { %v65_v29 = vsub.f32 1.5, %v64_v28 }
 0x107   :  { %v136_v30 = vpop.eup %135 }
 0x108   :  { %v66_v31 = vmul.f32 %v134_v24, %v65_v29  ;;  %v74_v32 = vmul.f32 %v136_v30, %v60_v25 }
 0x10a   :  { %v67_v33 = vmul.f32 %v66_v31, %v59_v22  ;;  %v75_v34 = vmul.f32 %v136_v30, %v74_v32 }
 0x10c   :  { %v76_v36 = vmul.f32 0.5, %v75_v34  ;;  %v69_v37 = vsel %vm68_vm2, %v59_v22, %v67_v33 }
 0x10d   :  { %v72_v38 = vsel %vm70_vm3, %v71_v35, %v69_v37 }
 0x10e   :  { %v77_v39 = vsub.f32 1.5, %v76_v36  ;;  %v85_v40 = vadd.f32 1e-06, %v72_v38 }
 0x110   :  { %v78_v41 = vmul.f32 %v136_v30, %v77_v39  ;;  %137 = vrcp.f32 %v85_v40 }
 0x112   :  { %v79_v42 = vmul.f32 %v78_v41, %v60_v25 }
 0x114   :  { %v81_v44 = vsel %vm80_vm4, %v60_v25, %v79_v42 }
 0x115   :  { %v84_v45 = vsel %vm82_vm5, %v83_v43, %v81_v44 }
 0x116   :  { %v138_v47 = vpop.eup %137  ;;  %v86_v48 = vadd.f32 1e-06, %v84_v45 }
 0x117   :  { %v90_v49 = vmul.f32 %v138_v47, %v49_v13 }
 0x118   :  { %139 = vrcp.f32 %v86_v48 }
 0x119   :  { %v95_v51 = vmul.f32 %v129_v46, %v90_v49 }
 0x11b   :  { %v101_v52 = vadd.f32 %v130_v50, %v95_v51 }
 0x11d   :  { %103 = vst.msk [vmem:[#allocation5] sm:$0xff] %vm33_vm0, %v101_v52 }
 0x11e   :  { %v140_v53 = vpop.eup %139 }
 0x11f   :  { %v91_v54 = vmul.f32 %v140_v53, %v50_v18 }
 0x121   :  { %v96_v55 = vmul.f32 %v129_v46, %v91_v54 }
 0x123   :  { %v102_v56 = vadd.f32 %v130_v50, %v96_v55 }
 0x125   :  { %104 = vst.msk [vmem:[#allocation5 + $0x8] sm:$0xff] %vm33_vm0, %v102_v56 }
 0x126   :  { %117 = dma.vmem_to_hbm [thread:$0]  %s110_s23, 256, %s112_s1, [#allocation4], %s194_s17, %s194_s17, %s195_s18  }
 0x127   :  { %191 = dma.done.wait [#allocation4], 256  }
 0x128   :  { %192 = vsyncadd [#allocation4], 4294967040 }
 0x129   :  { %122 = vsyncpa [#allocation3], 1 }
 0x12a   :  { %123 = vsyncpa [#allocation4], 1 }

</bundles_post_ra>
